<compile_context>
chip_gen: v6e
topology: v6e:2x2x1
jax: 0.10.0
libtpu: 0.0.40
codegen_flags: <defaults>
</compile_context>

<pallas_src>
import functools

import jax
import jax.numpy as jnp
from jax.experimental import pallas as pl
from jax.experimental.pallas import tpu as pltpu


def _round_up(x, m):
    return (x + m - 1) // m * m


# ----------------------------- stage 1: fused X @ [W_conv | W_res] -----------------------------
def _xw_res_kernel(x_ref, wcat_ref, bres_ref, xwconv_ref, res_ref, *, out_pad):
    # One MXU pass over X for both branches (bf16 inputs, f32 accumulation).
    x = x_ref[...].astype(jnp.bfloat16)                       # (tm, in)
    w = wcat_ref[...].astype(jnp.bfloat16)                    # (in, 2*out_pad)
    xw = jnp.dot(x, w, preferred_element_type=jnp.float32)    # (tm, 2*out_pad)
    # Conv half: stored bf16 — it is only ever used as an MXU input in stage 2.
    xwconv_ref[...] = xw[:, :out_pad].astype(jnp.bfloat16)
    # Residual half: relu(Linear(x)) finished here, kept f32 for elementwise math.
    res_ref[...] = jnp.maximum(xw[:, out_pad:] + bres_ref[...], 0.0)


# ------------------- stage 2: adjacency aggregation + residual + partial BN stats ---------------
def _agg_kernel(adj_ref, xwconv_ref, bconv_ref, res_ref, h_ref, stats_ref):
    # adj row tile (tm, N) bf16  @  resident xw_conv (N, P) bf16  -> f32
    agg = jnp.dot(adj_ref[...], xwconv_ref[...], preferred_element_type=jnp.float32)
    conv = jnp.maximum(agg + bconv_ref[...], 0.0)             # GraphConv bias + relu
    h = conv + res_ref[...]                                   # residual add (dropout p=0)
    h_ref[...] = h
    # Per-tile partial BatchNorm statistics over this tile's rows.
    stats_ref[:, 0:1, :] = jnp.sum(h, axis=0, keepdims=True)[None]        # sum
    stats_ref[:, 1:2, :] = jnp.sum(h * h, axis=0, keepdims=True)[None]    # sum of squares


# ----------------------------- stage 3: BatchNorm finalize + normalize --------------------------
def _bn_kernel(h_ref, stats_ref, gamma_ref, beta_ref, out_ref, *, inv_n, eps):
    stats = stats_ref[...]                                    # (nt, 2, P) partials, resident
    tot = jnp.sum(stats, axis=0)                              # (2, P)
    mean = tot[0:1, :] * inv_n                                # E[h]
    var = jnp.maximum(tot[1:2, :] * inv_n - mean * mean, 0.0) # biased var = E[h^2]-E[h]^2
    scale = jax.lax.rsqrt(var + eps) * gamma_ref[...]
    out_ref[...] = (h_ref[...] - mean) * scale + beta_ref[...]


def gcn_layer(adj, x, w_conv, b_conv, w_res, b_res, gamma, beta, *, eps=1e-5, row_tile=128):
    """adj: (N, N) float (0/1); x: (N, in); w_*: (in, out); b_*/gamma/beta: (1, out)."""
    N, in_feats = x.shape
    out_feats = w_conv.shape[1]
    P = _round_up(out_feats, 128)              # lane-dense padded feature width
    tm = min(row_tile, N)
    assert N % tm == 0, "number of nodes must be a multiple of the row tile"
    nt = N // tm

    # One-time parameter packing: zero-pad to lane-dense width, fuse conv+res weights.
    pad_cols = lambda a: jnp.pad(a, ((0, 0), (0, P - out_feats)))
    w_cat = jnp.concatenate([pad_cols(w_conv), pad_cols(w_res)], axis=1)   # (in, 2P)
    b_conv_p = pad_cols(b_conv)
    b_res_p = pad_cols(b_res)
    gamma_p = pad_cols(gamma)
    beta_p = pad_cols(beta)
    adj_bf16 = adj.astype(jnp.bfloat16)        # exact for 0/1 entries; halves HBM/VMEM traffic

    def cparams():
        # Explicit VMEM budget: 32 MiB is safe on v5e/v6e (128 MiB) and v7x (64 MiB, 32 scoped).
        return pltpu.CompilerParams(dimension_semantics=("parallel",),
                                    vmem_limit_bytes=32 * 1024 * 1024)

    # -------- stage 1: xw_conv (bf16) and finished residual branch (f32), row tiled --------
    xw_conv, res_act = pl.pallas_call(
        functools.partial(_xw_res_kernel, out_pad=P),
        grid=(nt,),
        in_specs=[pl.BlockSpec((tm, in_feats), lambda i: (i, 0)),
                  pl.BlockSpec((in_feats, 2 * P), lambda i: (0, 0)),
                  pl.BlockSpec((1, P), lambda i: (0, 0))],
        out_specs=[pl.BlockSpec((tm, P), lambda i: (i, 0)),
                   pl.BlockSpec((tm, P), lambda i: (i, 0))],
        out_shape=[jax.ShapeDtypeStruct((N, P), jnp.bfloat16),
                   jax.ShapeDtypeStruct((N, P), jnp.float32)],
        compiler_params=cparams(),
        cost_estimate=pl.CostEstimate(
            flops=2 * N * in_feats * 2 * P, transcendentals=0,
            bytes_accessed=4 * N * in_feats + 4 * in_feats * 2 * P + 2 * N * P + 4 * N * P),
    )(x, w_cat, b_res_p)

    # -------- stage 2: A @ xw_conv + bias, relu, + residual, per-tile BN partials --------
    h, part_stats = pl.pallas_call(
        _agg_kernel,
        grid=(nt,),
        in_specs=[pl.BlockSpec((tm, N), lambda i: (i, 0)),      # adjacency row tile (bf16)
                  pl.BlockSpec((N, P), lambda i: (0, 0)),       # xw_conv, resident in VMEM
                  pl.BlockSpec((1, P), lambda i: (0, 0)),       # conv bias
                  pl.BlockSpec((tm, P), lambda i: (i, 0))],     # residual rows
        out_specs=[pl.BlockSpec((tm, P), lambda i: (i, 0)),
                   pl.BlockSpec((1, 2, P), lambda i: (i, 0, 0))],
        out_shape=[jax.ShapeDtypeStruct((N, P), jnp.float32),
                   jax.ShapeDtypeStruct((nt, 2, P), jnp.float32)],
        compiler_params=cparams(),
        cost_estimate=pl.CostEstimate(
            flops=2 * N * N * P + 4 * N * P, transcendentals=0,
            bytes_accessed=2 * N * N + 2 * N * P + 4 * N * P + 4 * N * P + 4 * nt * 2 * P),
    )(adj_bf16, xw_conv, b_conv_p, res_act)

    # -------- stage 3: reduce partial stats on-chip, normalize (row tiled, parallel) --------
    out_padded = pl.pallas_call(
        functools.partial(_bn_kernel, inv_n=1.0 / N, eps=eps),
        grid=(nt,),
        in_specs=[pl.BlockSpec((tm, P), lambda i: (i, 0)),
                  pl.BlockSpec((nt, 2, P), lambda i: (0, 0, 0)),  # tiny, resident
                  pl.BlockSpec((1, P), lambda i: (0, 0)),
                  pl.BlockSpec((1, P), lambda i: (0, 0))],
        out_specs=pl.BlockSpec((tm, P), lambda i: (i, 0)),
        out_shape=jax.ShapeDtypeStruct((N, P), jnp.float32),
        compiler_params=cparams(),
        cost_estimate=pl.CostEstimate(
            flops=6 * N * P, transcendentals=nt * P,
            bytes_accessed=4 * N * P + 4 * nt * 2 * P + 8 * P + 4 * N * P),
    )(h, part_stats, gamma_p, beta_p)

    return out_padded[:, :out_feats]


# ------------------------------------ reference (pure JAX) ------------------------------------
def _ref_layer(adj, x, w_conv, b_conv, w_res, b_res, gamma, beta, eps=1e-5):
    # Mirrors the kernel's precision choices: bf16 MXU inputs, f32 accumulation/elementwise.
    xb = x.astype(jnp.bfloat16)
    xw_conv = jnp.dot(xb, w_conv.astype(jnp.bfloat16),
                      preferred_element_type=jnp.float32).astype(jnp.bfloat16)
    agg = jnp.dot(adj.astype(jnp.bfloat16), xw_conv, preferred_element_type=jnp.float32)
    conv = jnp.maximum(agg + b_conv, 0.0)
    res = jnp.maximum(jnp.dot(xb, w_res.astype(jnp.bfloat16),
                              preferred_element_type=jnp.float32) + b_res, 0.0)
    h = conv + res
    m = h.mean(0, keepdims=True)
    v = ((h - m) ** 2).mean(0, keepdims=True)          # biased (training-mode) variance
    return (h - m) * jax.lax.rsqrt(v + eps) * gamma + beta


if __name__ == "__main__":
    N, in_feats = 256, 32
    hidden_feats = [64, 64]                            # GCN default: two GCNLayers

    key = jax.random.PRNGKey(0)
    k_adj, k_x, k_params = jax.random.split(key, 3)

    # Random sparse-ish graph as a dense adjacency (A[dst, src] = 1).
    adj = (jax.random.uniform(k_adj, (N, N)) < 0.15).astype(jnp.float32)
    x = jax.random.normal(k_x, (N, in_feats), dtype=jnp.float32)

    # Deterministic per-layer parameters (PyTorch nn.Linear weights stored transposed).
    layers = []
    fan_in = in_feats
    for li, out_feats in enumerate(hidden_feats):
        kw, kb, kwr, kbr, k_params = jax.random.split(k_params, 5)
        layers.append(dict(
            w_conv=jax.random.normal(kw, (fan_in, out_feats), dtype=jnp.float32) * 0.1,
            b_conv=jax.random.normal(kb, (1, out_feats), dtype=jnp.float32) * 0.1,
            w_res=jax.random.normal(kwr, (fan_in, out_feats), dtype=jnp.float32) * 0.1,
            b_res=jax.random.normal(kbr, (1, out_feats), dtype=jnp.float32) * 0.1,
            gamma=jnp.ones((1, out_feats), dtype=jnp.float32),
            beta=jnp.zeros((1, out_feats), dtype=jnp.float32),
        ))
        fan_in = out_feats

    # Pallas forward through the stacked GCN.
    feats = x
    for p in layers:
        feats = gcn_layer(adj, feats, p["w_conv"], p["b_conv"], p["w_res"], p["b_res"],
                          p["gamma"], p["beta"])
    out = jax.block_until_ready(feats)

    # Pure-JAX reference with matching precision path.
    ref = x
    for p in layers:
        ref = _ref_layer(adj, ref, p["w_conv"], p["b_conv"], p["w_res"], p["b_res"],
                         p["gamma"], p["beta"])

    assert out.shape == (N, hidden_feats[-1])
    assert jnp.allclose(out, ref, atol=3e-3, rtol=3e-3), float(jnp.max(jnp.abs(out - ref)))

    print("KERNEL_OK")
</pallas_src>

<mosaic_0001>
module attributes {stable_mosaic.version = 11 : i64} {
  func.func @_xw_res_kernel(%arg0: i32, %arg1: memref<128x32xf32, #tpu.memory_space<vmem>>, %arg2: memref<32x256xf32, #tpu.memory_space<vmem>>, %arg3: memref<1x128xf32, #tpu.memory_space<vmem>>, %arg4: memref<128x128xbf16, #tpu.memory_space<vmem>>, %arg5: memref<128x128xf32, #tpu.memory_space<vmem>>) attributes {dimension_semantics = [#tpu.dimension_semantics<parallel>], iteration_bounds = array<i64: 2>, scalar_prefetch = 0 : i64, scratch_operands = 0 : i64, tpu.core_type = #tpu.core_type<tc>, window_params = [{transform_indices = @transform_0, window_bounds = array<i64: 128, 32>}, {pipeline_mode = #tpu.pipeline_mode<synchronous>, transform_indices = @transform_1, window_bounds = array<i64: 32, 256>}, {pipeline_mode = #tpu.pipeline_mode<synchronous>, transform_indices = @transform_2, window_bounds = array<i64: 1, 128>}, {transform_indices = @transform_3, window_bounds = array<i64: 128, 128>}, {transform_indices = @transform_4, window_bounds = array<i64: 128, 128>}]} {
    %c0 = arith.constant 0 : index
    %c0_0 = arith.constant 0 : index
    %0 = vector.load %arg1[%c0, %c0_0] : memref<128x32xf32, #tpu.memory_space<vmem>>, vector<128x32xf32>
    %1 = arith.truncf %0 : vector<128x32xf32> to vector<128x32xbf16>
    %c0_1 = arith.constant 0 : index
    %c0_2 = arith.constant 0 : index
    %2 = vector.load %arg2[%c0_1, %c0_2] : memref<32x256xf32, #tpu.memory_space<vmem>>, vector<32x256xf32>
    %3 = arith.truncf %2 : vector<32x256xf32> to vector<32x256xbf16>
    %cst = arith.constant dense<0.000000e+00> : vector<128x256xf32>
    %4 = tpu.matmul %1, %3, %cst {dimension_numbers = #tpu.dot_dimension_numbers<[1], [0], [0], [1], [0, 0, 1, 1], [], []>} : vector<128x32xbf16>, vector<32x256xbf16>, vector<128x256xf32> -> vector<128x256xf32>
    %5 = vector.extract_strided_slice %4 {offsets = [0, 0], sizes = [128, 128], strides = [1, 1]} : vector<128x256xf32> to vector<128x128xf32>
    %6 = arith.truncf %5 : vector<128x128xf32> to vector<128x128xbf16>
    %c0_3 = arith.constant 0 : index
    %c0_4 = arith.constant 0 : index
    %7 = vector.load %arg4[%c0_3, %c0_4] : memref<128x128xbf16, #tpu.memory_space<vmem>>, vector<128x128xbf16>
    tpu.vector_store %arg4[%c0_3, %c0_4], %6 {strides = array<i32>} : memref<128x128xbf16, #tpu.memory_space<vmem>>, vector<128x128xbf16>,
    %8 = vector.extract_strided_slice %4 {offsets = [0, 128], sizes = [128, 128], strides = [1, 1]} : vector<128x256xf32> to vector<128x128xf32>
    %c0_5 = arith.constant 0 : index
    %c0_6 = arith.constant 0 : index
    %9 = vector.load %arg3[%c0_5, %c0_6] : memref<1x128xf32, #tpu.memory_space<vmem>>, vector<1x128xf32>
    %10 = vector.broadcast %9 : vector<1x128xf32> to vector<128x128xf32>
    %11 = arith.addf %8, %10 : vector<128x128xf32>
    %cst_7 = arith.constant 0.000000e+00 : f32
    %12 = vector.broadcast %cst_7 : f32 to vector<128x128xf32>
    %13 = arith.maximumf %11, %12 : vector<128x128xf32>
    %c0_8 = arith.constant 0 : index
    %c0_9 = arith.constant 0 : index
    %14 = vector.load %arg5[%c0_8, %c0_9] : memref<128x128xf32, #tpu.memory_space<vmem>>, vector<128x128xf32>
    tpu.vector_store %arg5[%c0_8, %c0_9], %13 {strides = array<i32>} : memref<128x128xf32, #tpu.memory_space<vmem>>, vector<128x128xf32>,
    return
  }
  func.func @transform_0(%arg0: i32) -> (i32, i32) {
    %c0_i32 = arith.constant 0 : i32
    %c0_i32_0 = arith.constant 0 : i32
    return %arg0, %c0_i32 : i32, i32
  }
  func.func @transform_1(%arg0: i32) -> (i32, i32) {
    %c0_i32 = arith.constant 0 : i32
    %c0_i32_0 = arith.constant 0 : i32
    %c0_i32_1 = arith.constant 0 : i32
    return %c0_i32, %c0_i32_0 : i32, i32
  }
  func.func @transform_2(%arg0: i32) -> (i32, i32) {
    %c0_i32 = arith.constant 0 : i32
    %c0_i32_0 = arith.constant 0 : i32
    %c0_i32_1 = arith.constant 0 : i32
    return %c0_i32, %c0_i32_0 : i32, i32
  }
  func.func @transform_3(%arg0: i32) -> (i32, i32) {
    %c0_i32 = arith.constant 0 : i32
    %c0_i32_0 = arith.constant 0 : i32
    return %arg0, %c0_i32 : i32, i32
  }
  func.func @transform_4(%arg0: i32) -> (i32, i32) {
    %c0_i32 = arith.constant 0 : i32
    %c0_i32_0 = arith.constant 0 : i32
    return %arg0, %c0_i32 : i32, i32
  }
}

</mosaic_0001>

<bundles_post_ra>
// kernel: tpu_custom_call.1
= control target key start
LH: loop header
LB: loop body
LE: loop exit
PB: predicated region body
PF: predicated region fallthrough
CT: control target
= control target key end

     0   :  { %10 = vsyncpa [#allocation3], 0  ;;  %s1170_s0 = inlined_call_operand.vmem [shape: f32[256,32], index: 0, kind: input, shape index: {}]   ;;  %s1171_s1 = inlined_call_operand.vmem [shape: f32[32,256], index: 1, kind: input, shape index: {}]   ;;  %s1172_s2 = inlined_call_operand.vmem [shape: f32[1,128], index: 2, kind: input, shape index: {}]   ;;  %s1173_s3 = inlined_call_operand.hbm [shape: bf16[256,128], index: 3, kind: output, shape index: {0}]   ;;  %s1174_s4 = inlined_call_operand.hbm [shape: f32[256,128], index: 4, kind: output, shape index: {1}]  }
   0x1   :  { %12 = vsyncpa [#allocation3 + $0x1], 0 }
   0x2   :  { %13 = vsyncpa [#allocation5], 0 }
   0x3   :  { %15 = vsyncpa [#allocation5 + $0x1], 0  ;;  %s933_s15 = smov 0   ;;  %s935_s16 = smov 0  }
   0x4   :  { %s937_s17 = smov 0   ;;  %s939_s18 = smov 0  }
   0x5 LB: > { %s954_s19 = sadd.s32 4294967295, %s899_s18   ;;  %s650_s20 = sadd.s32 4294967294, %s899_s18   ;;  %s899_s18 = sphi %s939_s18, %s1180_s18   ;;  %s895_s17 = sphi %s937_s17, %s1179_s17   ;;  %s891_s16 = sphi %s935_s16, %s1178_s16   ;;  %s887_s15 = sphi %s933_s15, %s1177_s15  }
   0x6   : > { %s958_s21 = sadd.s32 1, %s899_s18   ;;  %s96_s22 = sadd.s32 1, %s895_s17 }
   0x7   : > { %s93_s23 = ssub.s32 %s899_s18, %s958_s21  ;;  %p106_p0 = scmp.ne.s32.totalorder %s895_s17, %s891_s16 }
   0x8   : > { %p94_p1 = scmp.eq.s32.totalorder %s93_s23, 0  ;;  %p107_p2 = scmp.eq.s32.totalorder %s954_s19, 1 }
   0x9   : > { %p112_p3 = scmp.ne.s32.totalorder %s891_s16, %s887_s15  ;;  %p113_p4 = scmp.eq.s32.totalorder %s650_s20, 1 }
   0xa   : > { %s969_s24 = scalar_select %p94_p1, %s895_s17, %s96_s22  }
   0xb   : > { %p971_p5 = por %p107_p2, %p106_p0  ;;  %p975_p6 = por %p113_p4, %p112_p3 }
   0xc   : > { %p653_p7 = scmp.ge.s32.totalorder %s899_s18, 1  ;;  %p172_p8 = scmp.lt.s32.totalorder %s899_s18, 3 }
   0xe   : > { %p173_p9 = pnand %p653_p7, %p172_p8 }
   0xf   : > { %s656_s7 = sshll.u32 (!%p173_p9), %s954_s19, 4  ;;  %s1036_s5 = sand.u32 (!%p173_p9), 1, %s891_s16  }
  0x10   : > { %176 = sbr.rel (%p173_p9) target bundleno = 293 (0x125), region = 32  ;;  %p204_p10 = scmp.lt.s32.totalorder (!%p173_p9), %s656_s7, 31 }
  0x11   : > { %s655_s8 = sshll.u32 (!%p173_p9), %s1036_s5, 7  ;;  %s654_s9 = sshll.u32 (!%p173_p9), %s1036_s5, 6 }
  0x12   : > { %s1047_s10 = scalar_lea.vmem (!%p173_p9), [#allocation4], %s655_s8  ;;  %s1051_s11 = scalar_lea.vmem (!%p173_p9), [#allocation2], %s654_s9 }
  0x13   : > { %s707_s12 = sshll.u32 (!%p173_p9), %s954_s19, 10  ;;  %s540_s13 = sshll.u32 (!%p173_p9), %s1051_s11, 4  ;;  %s1088_s13 = int_to_ptr.vmem [resolvable:$true] %s540_s13 }
  0x14   : > { %s1086_s22 = scalar_lea.hbm (!%p173_p9), %s1173_s3, %s707_s12  ;;  %s708_s23 = sshll.u32 (!%p173_p9), %s954_s19, 11 }
  0x15   : > { %v241_v0 = vld [vmem:[%s1171_s1 + $0x28] sm:$0xff]  ;;  %v243_v1 = vld [vmem:[%s1171_s1 + $0x38] sm:$0xff]  ;;  %v240_v2 = vld [vmem:[%s1171_s1 + $0x20] sm:$0xff]  ;;  %v901_v7 = vmov 0   ;;  %s1182_s7 = smov (!%p204_p10, %s656_s7), 31  ;;  %vm248_vm0 = vcmask 261120   ;;  %s1101_s29 = scalar_lea.hbm %s1174_s4, %s708_s23 }
  0x16   : > { %v247_v3 = vpack.c.bf16 %v243_v1, %v241_v0  ;;  %v242_v4 = vld [vmem:[%s1171_s1 + $0x30] sm:$0xff]  ;;  %v237_v5 = vld [vmem:[%s1171_s1 + $0x8] sm:$0xff]  ;;  %v239_v6 = vld [vmem:[%s1171_s1 + $0x18] sm:$0xff]  ;;  %305 = vmatprep.mubr.bf16.mxu0 %v901_v7  ;;  %345 = vmatprep.mubr.bf16.mxu1 %v901_v7  ;;  %s657_s27 = sshll.u32 %s1182_s7, 3  ;;  %s809_s6 = scalar_lea.vmem %s1088_s13, 1024 }
  0x17   : > { %v246_v8 = vpack.c.bf16 %v242_v4, %v240_v2  ;;  %v245_v9 = vpack.c.bf16 %v239_v6, %v237_v5  ;;  %v236_v10 = vld [vmem:[%s1171_s1] sm:$0xff]  ;;  %v238_v11 = vld [vmem:[%s1171_s1 + $0x10] sm:$0xff]  ;;  %s1009_s30 = scalar_lea.vmem %s1170_s0, %s657_s27  ;;  %s556_s27 = sshll.u32 %s1047_s10, 4  ;;  %s1103_s27 = int_to_ptr.vmem [resolvable:$true] %s556_s27 }
  0x18   : > { %285 = vmatprep.subr.bf16.mxu0 %v247_v3  ;;  %756 = vmatprep.subr.bf16.mxu1 %v247_v3  ;;  %v244_v12 = vpack.c.bf16 %v238_v11, %v236_v10  ;;  %v212_v13 = vld [vmem:[%s1009_s30] sm:$0xff]  ;;  %v213_v14 = vld [vmem:[%s1009_s30 + $0x8] sm:$0xff]  ;;  %v214_v19 = vld [vmem:[%s1009_s30 + $0x10] sm:$0xff]  ;;  %p810_p11 = scmp.ne.s32.totalorder %s1088_s13, %s809_s6  ;;  %s902_s7 = smov [#allocation2]  }
  0x19   : > { %286 = vmatpush1.bf16.msra.mxu0 %v246_v8  ;;  %758 = vmatpush1.bf16.msra.mxu1 %v246_v8  ;;  %v220_v15 = vld [vmem:[%s1009_s30 + $0x40] sm:$0xff]  ;;  %v228_v16 = vpack.c.bf16 %v213_v14, %v212_v13  ;;  %v221_v17 = vld [vmem:[%s1009_s30 + $0x48] sm:$0xff]  ;;  %v215_v20 = vld [vmem:[%s1009_s30 + $0x18] sm:$0xff]  ;;  %s813_s8 = sshll.u32 %s902_s7, 4  ;;  %s814_s8 = int_to_ptr.vmem [resolvable:$false] %s813_s8 }
  0x1a   : > { %287 = vmatprep.subr.bf16.mxu0 %v245_v9  ;;  %757 = vmatprep.subr.bf16.mxu1 %v245_v9  ;;  %v232_v18 = vpack.c.bf16 %v221_v17, %v220_v15  ;;  %v222_v21 = vld [vmem:[%s1009_s30 + $0x50] sm:$0xff]  ;;  %v223_v22 = vld [vmem:[%s1009_s30 + $0x58] sm:$0xff]  ;;  %v229_v23 = vpack.c.bf16 %v215_v20, %v214_v19  ;;  %v216_v25 = vld [vmem:[%s1009_s30 + $0x20] sm:$0xff]  ;;  %p811_p12 = pnand %p810_p11, %p971_p5  ;;  %s815_s9 = scalar_lea.vmem %s814_s8, 2048 }
  0x1b   : > { %v233_v24 = vpack.c.bf16 %v223_v22, %v222_v21  ;;  %v217_v26 = vld [vmem:[%s1009_s30 + $0x28] sm:$0xff]  ;;  %v224_v27 = vld [vmem:[%s1009_s30 + $0x60] sm:$0xff]  ;;  %v218_v31 = vld [vmem:[%s1009_s30 + $0x30] sm:$0xff]  ;;  %p816_p0 = scmp.lt.s32.totalorder %s1088_s13, %s814_s8  ;;  %p817_p1 = scmp.lt.s32.totalorder %s815_s9, %s809_s6 }
  0x1c   : > { %v225_v28 = vld [vmem:[%s1009_s30 + $0x68] sm:$0xff]  ;;  %v230_v29 = vpack.c.bf16 %v217_v26, %v216_v25  ;;  %v219_v32 = vld [vmem:[%s1009_s30 + $0x38] sm:$0xff]  ;;  %v226_v33 = vld [vmem:[%s1009_s30 + $0x70] sm:$0xff]  ;;  %p812_p13 = pneg %p811_p12 }
  0x1d   : > { %288 = vmatpush1.bf16.msra.mxu0 %v244_v12  ;;  %759 = vmatpush1.bf16.msra.mxu1 %v244_v12  ;;  %v234_v30 = vpack.c.bf16 %v225_v28, %v224_v27  ;;  %v227_v34 = vld [vmem:[%s1009_s30 + $0x78] sm:$0xff]  ;;  %v231_v35 = vpack.c.bf16 %v219_v32, %v218_v31  ;;  %v1041_v39 = vld [vmem:[%s1172_s2] ss:$0 sm:$0xff]  ;;  %s522_s30 = scalar_lea.sflag [#allocation3], %s1036_s5  ;;  %p818_p2 = por %p817_p1, %p816_p0 }
  0x1e   : > { %v235_v36 = vpack.c.bf16 %v227_v34, %v226_v33 }
  0x1f   : > { %p819_p3 = pnand %p818_p2, %p812_p13 }
  0x20   : > { %658 = vmatmul.mubr.msk.bf16.vlgmr.msra.gmra.mxu0 %vm248_vm0, %v228_v16  ;;  %662 = vmatmul.mubr.msk.bf16.vlgmr.msra.gmra.mxu1 %vm248_vm0, %v232_v18 }
  0x21   : > { %315 = vmatprep.mubr.bf16.mxu0 %v901_v7  ;;  %355 = vmatprep.mubr.bf16.mxu1 %v901_v7 }
  0x28   : > { %659 = vmatmul.mubr.msk.bf16.gmra.mxu0 %vm248_vm0, %v229_v23  ;;  %663 = vmatmul.mubr.msk.bf16.gmra.mxu1 %vm248_vm0, %v233_v24 }
  0x29   : > { %325 = vmatprep.mubr.bf16.mxu0 %v901_v7  ;;  %365 = vmatprep.mubr.bf16.mxu1 %v901_v7 }
  0x30   : > { %660 = vmatmul.mubr.msk.bf16.gmra.mxu0 %vm248_vm0, %v230_v29  ;;  %664 = vmatmul.mubr.msk.bf16.gmra.mxu1 %vm248_vm0, %v234_v30 }
  0x31   : > { %335 = vmatprep.mubr.bf16.mxu0 %v901_v7  ;;  %375 = vmatprep.mubr.bf16.mxu1 %v901_v7 }
  0x38   : > { %661 = vmatmul.mubr.msk.bf16.gmra.mxu0 %vm248_vm0, %v231_v35  ;;  %665 = vmatmul.mubr.msk.bf16.gmra.mxu1 %vm248_vm0, %v235_v36 }
  0xe0   : > { %v307_v37 = vpop.f32.mrf.mxu0  ;;  %v347_v38 = vpop.f32.mrf.mxu1 }
  0xe2   : > { %v309_v40 = vpop.f32.mrf.mxu0  ;;  %v349_v41 = vpop.f32.mrf.mxu1 }
  0xe3   : > { %v473_v42 = vadd.f32 %v1041_v39, %v309_v40  ;;  %v481_v43 = vadd.f32 %v1041_v39, %v349_v41 }
  0xe4   : > { %v311_v44 = vpop.f32.mrf.mxu0  ;;  %v351_v45 = vpop.f32.mrf.mxu1 }
  0xe5   : > { %v489_v46 = vmax.f32 %v473_v42, 0.0  ;;  %v497_v47 = vmax.f32 %v481_v43, 0.0  ;;  %v712_v48 = vpack.c.bf16 %v311_v44, %v307_v37  ;;  %v732_v49 = vpack.c.bf16 %v351_v45, %v347_v38 }
  0xe6   : > { %v313_v50 = vpop.f32.mrf.mxu0  ;;  %v353_v51 = vpop.f32.mrf.mxu1 }
  0xe7   : > { %505 = vst [vmem:[%s1047_s10] sm:$0xff] %v489_v46  ;;  %513 = vst [vmem:[%s1047_s10 + $0x40] sm:$0xff] %v497_v47  ;;  %v474_v52 = vadd.f32 %v1041_v39, %v313_v50  ;;  %v482_v53 = vadd.f32 %v1041_v39, %v353_v51 }
  0xe8   : > { %713 = vst [vmem:[%s1051_s11] sm:$0xff] %v712_v48   ;;  %752 = vst [vmem:[%s1051_s11 + $0x20] sm:$0xff] %v732_v49   ;;  %v317_v54 = vpop.f32.mrf.mxu0  ;;  %v357_v55 = vpop.f32.mrf.mxu1 }
  0xe9   : > { %v490_v56 = vmax.f32 %v474_v52, 0.0  ;;  %v498_v57 = vmax.f32 %v482_v53, 0.0 }
  0xea   : > { %v319_v58 = vpop.f32.mrf.mxu0  ;;  %v359_v59 = vpop.f32.mrf.mxu1 }
  0xeb   : > { %506 = vst [vmem:[%s1047_s10 + $0x8] sm:$0xff] %v490_v56  ;;  %514 = vst [vmem:[%s1047_s10 + $0x48] sm:$0xff] %v498_v57  ;;  %v475_v60 = vadd.f32 %v1041_v39, %v319_v58  ;;  %v483_v61 = vadd.f32 %v1041_v39, %v359_v59 }
  0xec   : > { %v321_v62 = vpop.f32.mrf.mxu0  ;;  %v361_v63 = vpop.f32.mrf.mxu1 }
  0xed   : > { %v491_v0 = vmax.f32 %v475_v60, 0.0  ;;  %v499_v1 = vmax.f32 %v483_v61, 0.0  ;;  %v717_v2 = vpack.c.bf16 %v321_v62, %v317_v54  ;;  %v737_v3 = vpack.c.bf16 %v361_v63, %v357_v55 }
  0xee   : > { %v323_v4 = vpop.f32.mrf.mxu0  ;;  %v363_v5 = vpop.f32.mrf.mxu1 }
  0xef   : > { %507 = vst [vmem:[%s1047_s10 + $0x10] sm:$0xff] %v491_v0  ;;  %515 = vst [vmem:[%s1047_s10 + $0x50] sm:$0xff] %v499_v1  ;;  %v476_v6 = vadd.f32 %v1041_v39, %v323_v4  ;;  %v484_v7 = vadd.f32 %v1041_v39, %v363_v5 }
  0xf0   : > { %749 = vst [vmem:[%s1051_s11 + $0x8] sm:$0xff] %v717_v2   ;;  %753 = vst [vmem:[%s1051_s11 + $0x28] sm:$0xff] %v737_v3   ;;  %v327_v8 = vpop.f32.mrf.mxu0  ;;  %v367_v9 = vpop.f32.mrf.mxu1 }
  0xf1   : > { %v492_v10 = vmax.f32 %v476_v6, 0.0  ;;  %v500_v11 = vmax.f32 %v484_v7, 0.0 }
  0xf2   : > { %v329_v12 = vpop.f32.mrf.mxu0  ;;  %v369_v13 = vpop.f32.mrf.mxu1 }
  0xf3   : > { %508 = vst [vmem:[%s1047_s10 + $0x18] sm:$0xff] %v492_v10  ;;  %516 = vst [vmem:[%s1047_s10 + $0x58] sm:$0xff] %v500_v11  ;;  %v477_v14 = vadd.f32 %v1041_v39, %v329_v12  ;;  %v485_v15 = vadd.f32 %v1041_v39, %v369_v13 }
  0xf4   : > { %v331_v16 = vpop.f32.mrf.mxu0  ;;  %v371_v17 = vpop.f32.mrf.mxu1 }
  0xf5   : > { %v493_v18 = vmax.f32 %v477_v14, 0.0  ;;  %v501_v19 = vmax.f32 %v485_v15, 0.0  ;;  %v722_v20 = vpack.c.bf16 %v331_v16, %v327_v8  ;;  %v742_v21 = vpack.c.bf16 %v371_v17, %v367_v9 }
  0xf6   : > { %v333_v22 = vpop.f32.mrf.mxu0  ;;  %v373_v23 = vpop.f32.mrf.mxu1 }
  0xf7   : > { %509 = vst [vmem:[%s1047_s10 + $0x20] sm:$0xff] %v493_v18  ;;  %517 = vst [vmem:[%s1047_s10 + $0x60] sm:$0xff] %v501_v19  ;;  %v478_v24 = vadd.f32 %v1041_v39, %v333_v22  ;;  %v486_v25 = vadd.f32 %v1041_v39, %v373_v23 }
  0xf8   : > { %750 = vst [vmem:[%s1051_s11 + $0x10] sm:$0xff] %v722_v20   ;;  %754 = vst [vmem:[%s1051_s11 + $0x30] sm:$0xff] %v742_v21   ;;  %v337_v26 = vpop.f32.mrf.mxu0  ;;  %v377_v27 = vpop.f32.mrf.mxu1 }
  0xf9   : > { %v494_v28 = vmax.f32 %v478_v24, 0.0  ;;  %v502_v29 = vmax.f32 %v486_v25, 0.0 }
  0xfa   : > { %v339_v30 = vpop.f32.mrf.mxu0  ;;  %v379_v31 = vpop.f32.mrf.mxu1 }
  0xfb   : > { %510 = vst [vmem:[%s1047_s10 + $0x28] sm:$0xff] %v494_v28  ;;  %518 = vst [vmem:[%s1047_s10 + $0x68] sm:$0xff] %v502_v29  ;;  %v479_v32 = vadd.f32 %v1041_v39, %v339_v30  ;;  %v487_v33 = vadd.f32 %v1041_v39, %v379_v31 }
  0xfc   : > { %v341_v34 = vpop.f32.mrf.mxu0  ;;  %v381_v35 = vpop.f32.mrf.mxu1 }
  0xfd   : > { %v495_v36 = vmax.f32 %v479_v32, 0.0  ;;  %v503_v37 = vmax.f32 %v487_v33, 0.0  ;;  %v727_v38 = vpack.c.bf16 %v341_v34, %v337_v26  ;;  %v747_v40 = vpack.c.bf16 %v381_v35, %v377_v27 }
  0xfe   : > { %v343_v41 = vpop.f32.mrf.mxu0  ;;  %v383_v42 = vpop.f32.mrf.mxu1 }
  0xff   : > { %511 = vst [vmem:[%s1047_s10 + $0x30] sm:$0xff] %v495_v36  ;;  %519 = vst [vmem:[%s1047_s10 + $0x70] sm:$0xff] %v503_v37  ;;  %v480_v43 = vadd.f32 %v1041_v39, %v343_v41  ;;  %v488_v44 = vadd.f32 %v1041_v39, %v383_v42 }
 0x100   : > { %751 = vst [vmem:[%s1051_s11 + $0x18] sm:$0xff] %v727_v38   ;;  %755 = vst [vmem:[%s1051_s11 + $0x38] sm:$0xff] %v747_v40  }
 0x101   : > { %822 = shalt.err (!%p819_p3)
}
 0x102   : > { %s823_s11 = scalar_lea.hbm %s1086_s22, 1024  ;;  %s827_s20 = scalar_lea.hbm %s1173_s3, 2048 }
 0x103   : > { %p824_p4 = scmp.ne.s32.totalorder %s1086_s22, %s823_s11  ;;  %p828_p9 = scmp.lt.s32.totalorder %s1086_s22, %s1173_s3 }
 0x104   : > { %p829_p10 = scmp.lt.s32.totalorder %s827_s20, %s823_s11 }
 0x105   : > { %p825_p7 = pnand %p824_p4, %p971_p5 }
 0x106   : > { %p830_p11 = por %p829_p10, %p828_p9 }
 0x107   : > { %p826_p8 = pneg %p825_p7 }
 0x109   : > { %p831_p12 = pnand %p830_p11, %p826_p8 }
 0x10b   : > { %834 = shalt.err (!%p831_p12)
}
 0x10c   : > { %s903_s28 = smov 64   ;;  %s904_s6 = smov 4   ;;  %v496_v39 = vmax.f32 %v480_v43, 0.0  ;;  %v504_v45 = vmax.f32 %v488_v44, 0.0 }
 0x10d   : > { %760 = dma.vmem_to_hbm [thread:$0]  (%p971_p5), %s1088_s13, 1024, %s1086_s22, %s522_s30, %s903_s28, %s903_s28, %s904_s6  }
 0x10e   : > { %512 = vst [vmem:[%s1047_s10 + $0x38] sm:$0xff] %v496_v39  ;;  %520 = vst [vmem:[%s1047_s10 + $0x78] sm:$0xff] %v504_v45  ;;  %s527_s7 = scalar_lea.sflag [#allocation5], %s1036_s5  ;;  %s835_s8 = scalar_lea.vmem %s1103_s27, 2048 }
 0x10f   : > { %p836_p13 = scmp.ne.s32.totalorder %s1103_s27, %s835_s8  ;;  %s905_s9 = smov [#allocation4]  }
 0x110   : > { %s839_s11 = sshll.u32 %s905_s9, 4  ;;  %s840_s11 = int_to_ptr.vmem [resolvable:$false] %s839_s11 }
 0x111   : > { %p837_p0 = pnand %p836_p13, %p971_p5  ;;  %s841_s12 = scalar_lea.vmem %s840_s11, 4096 }
 0x112   : > { %p842_p2 = scmp.lt.s32.totalorder %s1103_s27, %s840_s11  ;;  %p843_p3 = scmp.lt.s32.totalorder %s841_s12, %s835_s8 }
 0x113   : > { %p838_p1 = pneg %p837_p0 }
 0x114   : > { %p844_p4 = por %p843_p3, %p842_p2 }
 0x116   : > { %p845_p7 = pnand %p844_p4, %p838_p1 }
 0x118   : > { %848 = shalt.err (!%p845_p7)
}
 0x119   : > { %s849_s10 = scalar_lea.hbm %s1101_s29, 2048  ;;  %s853_s30 = scalar_lea.hbm %s1174_s4, 4096 }
 0x11a   : > { %p850_p8 = scmp.ne.s32.totalorder %s1101_s29, %s849_s10  ;;  %p854_p11 = scmp.lt.s32.totalorder %s1101_s29, %s1174_s4 }
 0x11b   : > { %p855_p12 = scmp.lt.s32.totalorder %s853_s30, %s849_s10 }
 0x11c   : > { %p851_p9 = pnand %p850_p8, %p971_p5 }
 0x11d   : > { %p856_p13 = por %p855_p12, %p854_p11 }
 0x11e   : > { %p852_p10 = pneg %p851_p9 }
 0x120   : > { %p857_p0 = pnand %p856_p13, %p852_p10 }
 0x122   : > { %860 = shalt.err (!%p857_p0)
}
 0x123   : > { %s906_s23 = smov 128   ;;  %s907_s19 = smov 8  }
 0x124   : > { %761 = dma.vmem_to_hbm [thread:$0]  (%p971_p5), %s1103_s27, 2048, %s1101_s29, %s527_s7, %s906_s23, %s906_s23, %s907_s19  }
 0x125 PF: > { %p771_p1 = scmp.ge.s32.totalorder %s899_s18, 2  ;;  %s571_s28 = sand.u32 1, %s887_s15  }
 0x126   : > { %s572_s6 = scalar_lea.sflag [#allocation3], %s571_s28 }
 0x127   : > { %p765_p2 = pnand %p771_p1, %p975_p6 }
 0x129   : > { %p766_p3 = pneg %p765_p2 }
 0x12b   : > { %878 = dma.done.wait (%p766_p3), %s572_s6, 1024  }
 0x12c   : > { %880 = vsyncadd (%p766_p3), %s572_s6, 4294966272  ;;  %s581_s8 = scalar_lea.sflag [#allocation5], %s571_s28 }
 0x12d   : > { %882 = dma.done.wait (%p766_p3), %s581_s8, 2048  }
 0x12e   : > { %884 = vsyncadd (%p766_p3), %s581_s8, 4294965248  ;;  %p18_p5 = scmp.ge.s32.totalorder %s958_s21, 4   ;;  %s1177_s15 = smov %s891_s16 }
 0x12f   : > { %s1178_s16 = smov %s895_s17  ;;  %s1179_s17 = smov %s969_s24 }
 0x130   : > { %s1180_s18 = smov %s958_s21  ;;  %20 = sbr.rel (!%p18_p5) target bundleno = 5 (0x5), region = 84 }
 0x135   :  { %586 = vsyncpa [#allocation3], 1 }
 0x136   :  { %588 = vsyncpa [#allocation3 + $0x1], 1 }
 0x137   :  { %589 = vsyncpa [#allocation5], 1 }
 0x138   :  { %591 = vsyncpa [#allocation5 + $0x1], 1 }

</bundles_post_ra>
